<compile_context>
chip_gen: v6e
topology: v6e:2x2x1
jax: 0.10.0
libtpu: 0.0.40
codegen_flags: <defaults>
</compile_context>

<pallas_src>
import jax
import jax.numpy as jnp
from jax.experimental import pallas as pl
from jax.experimental.pallas import tpu as pltpu


def _hbm_copy_kernel(x_hbm_ref, o_hbm_ref, sem):
    # Single HBM -> HBM DMA of the whole array; no VMEM staging, no grid.
    cp = pltpu.make_async_copy(x_hbm_ref, o_hbm_ref, sem)
    cp.start()
    cp.wait()


def _pallas_identity_copy(x: jax.Array) -> jax.Array:
    """Materialized identity copy via one direct HBM->HBM async DMA."""
    if x.size == 0:
        # Nothing to copy; no kernel needed.
        return x

    nbytes = x.size * jnp.dtype(x.dtype).itemsize
    return pl.pallas_call(
        _hbm_copy_kernel,
        out_shape=jax.ShapeDtypeStruct(x.shape, x.dtype),
        in_specs=[pl.BlockSpec(memory_space=pl.ANY)],
        out_specs=pl.BlockSpec(memory_space=pl.ANY),
        scratch_shapes=[pltpu.SemaphoreType.DMA(())],
        cost_estimate=pl.CostEstimate(
            flops=0, transcendentals=0, bytes_accessed=2 * nbytes
        ),
    )(x)


def base_model_forward(x: jax.Array, *, materialize_copy: bool = False) -> jax.Array:
    """BaseModel.forward (abstract stub) == identity.

    The fastest correct identity issues no kernel and moves no bytes, so that
    is the default. Pass materialize_copy=True to force a fresh output buffer
    produced by the HBM->HBM DMA copy kernel.
    """
    if not materialize_copy:
        return x
    return _pallas_identity_copy(x)


class BaseModelJAX:
    """Mirror of the (parameter-free) PyTorch BaseModel."""

    def __init__(self):
        # BaseModel.__init__ defines no parameters.
        self.params = {}

    def forward(self, x: jax.Array, **kwargs) -> jax.Array:
        return base_model_forward(x, **kwargs)

    def __call__(self, x: jax.Array, **kwargs) -> jax.Array:
        return self.forward(x, **kwargs)


if __name__ == "__main__":
    key = jax.random.PRNGKey(0)
    # Small NCHW-style input consistent with the PyTorch convention.
    x = jax.random.normal(key, (2, 4, 16, 16), dtype=jnp.float32)

    model = BaseModelJAX()

    # Default identity path: no kernel, no HBM traffic.
    y_fast = model(x)
    assert y_fast.shape == x.shape and y_fast.dtype == x.dtype

    # Explicit Pallas copy path (single HBM->HBM DMA).
    y = jax.block_until_ready(model(x, materialize_copy=True))
    assert y.shape == x.shape and y.dtype == x.dtype
    assert bool(jnp.array_equal(y, x))

    # The DMA path is shape/dtype agnostic: odd element count, packed dtype.
    k2 = jax.random.PRNGKey(1)
    x2 = jax.random.normal(k2, (3, 5, 7), dtype=jnp.bfloat16)
    y2 = jax.block_until_ready(model(x2, materialize_copy=True))
    assert y2.shape == x2.shape and y2.dtype == x2.dtype
    assert bool(jnp.array_equal(y2, x2))

    print("KERNEL_OK")
</pallas_src>

<mosaic_0001>
module attributes {stable_mosaic.version = 11 : i64} {
  func.func @_hbm_copy_kernel(%arg0: memref<2x4x16x16xf32, #tpu.memory_space<any>>, %arg1: memref<2x4x16x16xf32, #tpu.memory_space<any>>, %arg2: memref<!tpu.dma_semaphore, #tpu.memory_space<semaphore_mem>>) attributes {dimension_semantics = [], scalar_prefetch = 0 : i64, scratch_operands = 1 : i64, tpu.core_type = #tpu.core_type<tc>} {
    tpu.enqueue_dma source(%arg0 : memref<2x4x16x16xf32, #tpu.memory_space<any>>) target(%arg1 : memref<2x4x16x16xf32, #tpu.memory_space<any>>) target_semaphore(%arg2 : memref<!tpu.dma_semaphore, #tpu.memory_space<semaphore_mem>>)
    tpu.wait_dma2 semaphore(%arg2 : memref<!tpu.dma_semaphore, #tpu.memory_space<semaphore_mem>>) src(%arg0 : memref<2x4x16x16xf32, #tpu.memory_space<any>>) dst(%arg1 : memref<2x4x16x16xf32, #tpu.memory_space<any>>)
    return
  }
}

</mosaic_0001>

<bundles_post_ra>
// kernel: tpu_custom_call.1
= control target key start
LH: loop header
LB: loop body
LE: loop exit
PB: predicated region body
PF: predicated region fallthrough
CT: control target
= control target key end

     0   :  { %s30_s6 = smov [#allocation2]   ;;  %s31_s7 = smov 131072   ;;  %s49_s0 = inlined_call_operand.hbm [shape: f32[2,4,16,16], index: 0, kind: input, shape index: {}]   ;;  %s50_s1 = inlined_call_operand.hbm [shape: f32[2,4,16,16], index: 1, kind: output, shape index: {}]  }
   0x1   :  { %s32_s8 = smov 0  }
   0x2   :  { %12 = dma.general %s49_s0, 2048, %s50_s1, %s30_s6, %s31_s7, [#allocation4], %s32_s8, 0  }
   0x3   :  { %28 = dma.done.wait [#allocation2], 2048 }
   0x4   :  { %29 = vsyncadd [#allocation2], 4294965248 }
   0x5   :  { %18 = vsyncmov [#allocation2] }
   0x8   :  { %s19_s13 = vpop.sfrf %18 }
   0x9   :  { %p24_p0 = scmp.ne.s32.totalorder %s19_s13, 0 }
   0xb   :  { %23 = shalt.err (%p24_p0)  }

</bundles_post_ra>
